<compile_context>
chip_gen: v7x
topology: tpu7x:2x2x1
jax: 0.10.0
libtpu: 0.0.40
codegen_flags: <defaults>
</compile_context>

<pallas_src>
import functools

import jax
import jax.numpy as jnp
from jax import lax
from jax.experimental import pallas as pl
from jax.experimental.pallas import tpu as pltpu


def gru_kernel(seq_len, batch, hidden,
               emb_ref, wih_ref, whh_ref, bcomb_ref, bhn_ref,
               out_ref, gi_ref):
    """Full GRU recurrence in a single kernel invocation.

    emb_ref   : (seq_len*batch, embed)   time-major, flattened over (t, b)
    wih_ref   : (embed,  3*hidden)       W_ih^T   (PyTorch gate order [r|z|n])
    whh_ref   : (hidden, 3*hidden)       W_hh^T
    bcomb_ref : (1, 3*hidden)            [b_ir+b_hr | b_iz+b_hz | b_in]
    bhn_ref   : (1, hidden)              b_hn (must stay inside r*(...) term)
    out_ref   : (seq_len*batch, hidden)  every per-step hidden state
    gi_ref    : VMEM scratch (seq_len*batch, 3*hidden) — hoisted input proj.
    """
    # --- hoisted input projection: one large MXU matmul covering all steps.
    gi_ref[...] = (
        jnp.dot(emb_ref[...], wih_ref[...], preferred_element_type=jnp.float32)
        + bcomb_ref[...]
    )

    whh = whh_ref[...]                                    # (H, 3H), loop-resident
    # Hoist the (1,H) -> (B,H) broadcast out of the loop (no CSE inside loops).
    bhn_b = jnp.broadcast_to(bhn_ref[...], (batch, hidden)).astype(jnp.float32)

    def step(t, h_prev):
        row = pl.multiple_of(t * batch, batch)            # sublane-aligned (batch % 8 == 0)
        gi = gi_ref[pl.ds(row, batch), :]                 # (B, 3H) f32

        gh = jnp.dot(h_prev.astype(whh.dtype), whh,
                     preferred_element_type=jnp.float32)  # (B, 3H) f32, no bias

        i_r, i_z, i_n = gi[:, :hidden], gi[:, hidden:2 * hidden], gi[:, 2 * hidden:]
        h_r, h_z, h_n = gh[:, :hidden], gh[:, hidden:2 * hidden], gh[:, 2 * hidden:]

        r = jax.nn.sigmoid(i_r + h_r)                     # b_ir+b_hr already in i_r
        z = jax.nn.sigmoid(i_z + h_z)                     # b_iz+b_hz already in i_z
        n = jnp.tanh(i_n + r * (h_n + bhn_b))             # b_in in i_n, b_hn inside r*()
        h_new = n + z * (h_prev - n)                      # == (1-z)*n + z*h_prev

        out_ref[pl.ds(row, batch), :] = h_new.astype(out_ref.dtype)
        return h_new

    h0 = jnp.zeros((batch, hidden), jnp.float32)
    # seq_len is small & static -> fully unroll so the LLO scheduler sees it all.
    lax.fori_loop(0, seq_len, step, h0, unroll=True)


def gru_forward(embedded, w_ih, w_hh, b_ih, b_hh, hidden_size,
                matmul_dtype=jnp.float32):
    """embedded: (seq, batch, embed) f32; weights in PyTorch layout (3H,E)/(3H,H)."""
    seq_len, batch, embed = embedded.shape
    H = hidden_size
    H3 = 3 * H

    # Layout plumbing done once in the wrapper.
    w_ih_t = jnp.transpose(w_ih).astype(matmul_dtype)             # (E, 3H)
    w_hh_t = jnp.transpose(w_hh).astype(matmul_dtype)             # (H, 3H)
    # Fold b_hr / b_hz into the hoisted projection bias; keep b_hn separate
    # (it must stay inside the r*(...) term, per PyTorch GRU semantics).
    b_comb = (b_ih + jnp.concatenate([b_hh[:2 * H], jnp.zeros((H,), b_hh.dtype)])
              ).reshape(1, H3).astype(jnp.float32)
    b_hn = b_hh[2 * H:].reshape(1, H).astype(jnp.float32)
    emb2d = embedded.reshape(seq_len * batch, embed).astype(matmul_dtype)

    kernel = functools.partial(gru_kernel, seq_len, batch, hidden_size)

    out2d = pl.pallas_call(
        kernel,
        out_shape=jax.ShapeDtypeStruct((seq_len * batch, hidden_size), jnp.float32),
        grid_spec=pltpu.PrefetchScalarGridSpec(
            num_scalar_prefetch=0,
            grid=(1,),                                            # single invocation
            in_specs=[
                pl.BlockSpec((seq_len * batch, embed), lambda i: (0, 0)),  # X (all steps)
                pl.BlockSpec((embed, H3), lambda i: (0, 0)),               # W_ih^T
                pl.BlockSpec((hidden_size, H3), lambda i: (0, 0)),         # W_hh^T
                pl.BlockSpec((1, H3), lambda i: (0, 0)),                   # combined bias
                pl.BlockSpec((1, hidden_size), lambda i: (0, 0)),          # b_hn
            ],
            out_specs=pl.BlockSpec((seq_len * batch, hidden_size), lambda i: (0, 0)),
            scratch_shapes=[pltpu.VMEM((seq_len * batch, H3), jnp.float32)],
        ),
        compiler_params=pltpu.CompilerParams(
            dimension_semantics=("arbitrary",),
        ),
    )(emb2d, w_ih_t, w_hh_t, b_comb, b_hn)

    outputs = out2d.reshape(seq_len, batch, hidden_size)  # free: same row-major layout
    hidden = outputs[-1:]                                 # final h_T, shape (1, B, H)
    return outputs, hidden


def encoder_forward(src, params, matmul_dtype=jnp.float32):
    """src: (seq_len, batch) int32 token ids. Mirrors Encoder.forward."""
    embedded = jnp.take(params["embedding"], src, axis=0)  # (seq, batch, embed)
    outputs, hidden = gru_forward(
        embedded,
        params["w_ih"], params["w_hh"], params["b_ih"], params["b_hh"],
        params["hidden_size"],
        matmul_dtype=matmul_dtype,
    )
    return outputs, hidden


def init_params(key, input_size, embed_size, hidden_size):
    k_emb, k_wih, k_whh, k_bih, k_bhh = jax.random.split(key, 5)
    bound = 1.0 / jnp.sqrt(hidden_size)
    return {
        "embedding": jax.random.normal(k_emb, (input_size, embed_size), jnp.float32),
        "w_ih": jax.random.uniform(k_wih, (3 * hidden_size, embed_size), jnp.float32, -bound, bound),
        "w_hh": jax.random.uniform(k_whh, (3 * hidden_size, hidden_size), jnp.float32, -bound, bound),
        "b_ih": jax.random.uniform(k_bih, (3 * hidden_size,), jnp.float32, -bound, bound),
        "b_hh": jax.random.uniform(k_bhh, (3 * hidden_size,), jnp.float32, -bound, bound),
        "hidden_size": hidden_size,
    }


def _reference_gru(embedded, p):
    """Pure-JAX reference (lax.scan) matching PyTorch GRU semantics."""
    H = p["hidden_size"]

    def step(h, x):
        gi = x @ p["w_ih"].T + p["b_ih"]
        gh = h @ p["w_hh"].T + p["b_hh"]
        i_r, i_z, i_n = gi[:, :H], gi[:, H:2 * H], gi[:, 2 * H:]
        h_r, h_z, h_n = gh[:, :H], gh[:, H:2 * H], gh[:, 2 * H:]
        r = jax.nn.sigmoid(i_r + h_r)
        z = jax.nn.sigmoid(i_z + h_z)
        n = jnp.tanh(i_n + r * h_n)
        h_new = (1.0 - z) * n + z * h
        return h_new, h_new

    h0 = jnp.zeros((embedded.shape[1], H), jnp.float32)
    h_T, outs = jax.lax.scan(step, h0, embedded)
    return outs, h_T[None]


if __name__ == "__main__":
    SEQ_LEN = 10
    BATCH = 8
    SRC_VOCAB_SIZE = 100
    EMBED = 32
    HIDDEN = 32

    key = jax.random.PRNGKey(0)
    k_src, k_params = jax.random.split(key)

    src = jax.random.randint(k_src, (SEQ_LEN, BATCH), 0, SRC_VOCAB_SIZE, dtype=jnp.int32)
    params = init_params(k_params, SRC_VOCAB_SIZE, EMBED, HIDDEN)

    outputs, hidden = encoder_forward(src, params)
    outputs = jax.block_until_ready(outputs)
    hidden = jax.block_until_ready(hidden)

    assert outputs.shape == (SEQ_LEN, BATCH, HIDDEN)
    assert hidden.shape == (1, BATCH, HIDDEN)

    # Correctness check against a pure-JAX reference implementation (f32 path).
    embedded = jnp.take(params["embedding"], src, axis=0)
    ref_out, ref_hid = _reference_gru(embedded, params)
    assert jnp.allclose(outputs, ref_out, rtol=1e-5, atol=1e-5)
    assert jnp.allclose(hidden, ref_hid, rtol=1e-5, atol=1e-5)

    print("KERNEL_OK")
</pallas_src>

<mosaic_0001>
module attributes {stable_mosaic.version = 11 : i64} {
  func.func @gru_kernel(%arg0: i32, %arg1: memref<80x32xf32, #tpu.memory_space<vmem>>, %arg2: memref<32x96xf32, #tpu.memory_space<vmem>>, %arg3: memref<32x96xf32, #tpu.memory_space<vmem>>, %arg4: memref<1x96xf32, #tpu.memory_space<vmem>>, %arg5: memref<1x32xf32, #tpu.memory_space<vmem>>, %arg6: memref<80x32xf32, #tpu.memory_space<vmem>>, %arg7: memref<80x96xf32, #tpu.memory_space<vmem>>) attributes {dimension_semantics = [#tpu.dimension_semantics<arbitrary>], iteration_bounds = array<i64: 1>, scalar_prefetch = 0 : i64, scratch_operands = 1 : i64, tpu.core_type = #tpu.core_type<tc>, window_params = [{pipeline_mode = #tpu.pipeline_mode<synchronous>, transform_indices = @transform_0, window_bounds = array<i64: 80, 32>}, {pipeline_mode = #tpu.pipeline_mode<synchronous>, transform_indices = @transform_1, window_bounds = array<i64: 32, 96>}, {pipeline_mode = #tpu.pipeline_mode<synchronous>, transform_indices = @transform_2, window_bounds = array<i64: 32, 96>}, {pipeline_mode = #tpu.pipeline_mode<synchronous>, transform_indices = @transform_3, window_bounds = array<i64: 1, 96>}, {pipeline_mode = #tpu.pipeline_mode<synchronous>, transform_indices = @transform_4, window_bounds = array<i64: 1, 32>}, {pipeline_mode = #tpu.pipeline_mode<synchronous>, transform_indices = @transform_5, window_bounds = array<i64: 80, 32>}]} {
    %c0 = arith.constant 0 : index
    %c0_0 = arith.constant 0 : index
    %0 = vector.load %arg1[%c0, %c0_0] : memref<80x32xf32, #tpu.memory_space<vmem>>, vector<80x32xf32>
    %c0_1 = arith.constant 0 : index
    %c0_2 = arith.constant 0 : index
    %1 = vector.load %arg2[%c0_1, %c0_2] : memref<32x96xf32, #tpu.memory_space<vmem>>, vector<32x96xf32>
    %cst = arith.constant dense<0.000000e+00> : vector<80x96xf32>
    %2 = tpu.matmul %0, %1, %cst {dimension_numbers = #tpu.dot_dimension_numbers<[1], [0], [0], [1], [0, 0, 1, 1], [], []>} : vector<80x32xf32>, vector<32x96xf32>, vector<80x96xf32> -> vector<80x96xf32>
    %c0_3 = arith.constant 0 : index
    %c0_4 = arith.constant 0 : index
    %3 = vector.load %arg4[%c0_3, %c0_4] : memref<1x96xf32, #tpu.memory_space<vmem>>, vector<1x96xf32>
    %4 = vector.broadcast %3 : vector<1x96xf32> to vector<80x96xf32>
    %5 = arith.addf %2, %4 : vector<80x96xf32>
    %c0_5 = arith.constant 0 : index
    %c0_6 = arith.constant 0 : index
    %6 = vector.load %arg7[%c0_5, %c0_6] : memref<80x96xf32, #tpu.memory_space<vmem>>, vector<80x96xf32>
    tpu.vector_store %arg7[%c0_5, %c0_6], %5 {strides = array<i32>} : memref<80x96xf32, #tpu.memory_space<vmem>>, vector<80x96xf32>,
    %c0_7 = arith.constant 0 : index
    %c0_8 = arith.constant 0 : index
    %7 = vector.load %arg3[%c0_7, %c0_8] : memref<32x96xf32, #tpu.memory_space<vmem>>, vector<32x96xf32>
    %c0_9 = arith.constant 0 : index
    %c0_10 = arith.constant 0 : index
    %8 = vector.load %arg5[%c0_9, %c0_10] : memref<1x32xf32, #tpu.memory_space<vmem>>, vector<1x32xf32>
    %9 = vector.shape_cast %8 : vector<1x32xf32> to vector<1x32xf32>
    %10 = vector.broadcast %9 : vector<1x32xf32> to vector<8x32xf32>
    %cst_11 = arith.constant 0.000000e+00 : f32
    %11 = vector.broadcast %cst_11 : f32 to vector<8x32xf32>
    %c0_i32 = arith.constant 0 : i32
    %c8_i32 = arith.constant 8 : i32
    %12 = arith.muli %c0_i32, %c8_i32 : i32
    %13 = tpu.assume_multiple %12, 8 : i32
    %14 = arith.index_cast %13 : i32 to index
    %c0_12 = arith.constant 0 : index
    %15 = vector.load %arg7[%14, %c0_12] : memref<80x96xf32, #tpu.memory_space<vmem>>, vector<8x96xf32>
    %cst_13 = arith.constant dense<0.000000e+00> : vector<8x96xf32>
    %16 = tpu.matmul %11, %7, %cst_13 {dimension_numbers = #tpu.dot_dimension_numbers<[1], [0], [0], [1], [0, 0, 1, 1], [], []>} : vector<8x32xf32>, vector<32x96xf32>, vector<8x96xf32> -> vector<8x96xf32>
    %17 = vector.extract_strided_slice %15 {offsets = [0, 0], sizes = [8, 32], strides = [1, 1]} : vector<8x96xf32> to vector<8x32xf32>
    %18 = vector.extract_strided_slice %15 {offsets = [0, 32], sizes = [8, 32], strides = [1, 1]} : vector<8x96xf32> to vector<8x32xf32>
    %19 = vector.extract_strided_slice %15 {offsets = [0, 64], sizes = [8, 32], strides = [1, 1]} : vector<8x96xf32> to vector<8x32xf32>
    %20 = vector.extract_strided_slice %16 {offsets = [0, 0], sizes = [8, 32], strides = [1, 1]} : vector<8x96xf32> to vector<8x32xf32>
    %21 = vector.extract_strided_slice %16 {offsets = [0, 32], sizes = [8, 32], strides = [1, 1]} : vector<8x96xf32> to vector<8x32xf32>
    %22 = vector.extract_strided_slice %16 {offsets = [0, 64], sizes = [8, 32], strides = [1, 1]} : vector<8x96xf32> to vector<8x32xf32>
    %23 = arith.addf %17, %20 : vector<8x32xf32>
    %24 = arith.negf %23 : vector<8x32xf32>
    %25 = math.exp %24 : vector<8x32xf32>
    %cst_14 = arith.constant 1.000000e+00 : f32
    %26 = vector.broadcast %cst_14 : f32 to vector<8x32xf32>
    %27 = arith.addf %26, %25 : vector<8x32xf32>
    %28 = arith.divf %26, %27 : vector<8x32xf32>
    %29 = arith.addf %18, %21 : vector<8x32xf32>
    %30 = arith.negf %29 : vector<8x32xf32>
    %31 = math.exp %30 : vector<8x32xf32>
    %cst_15 = arith.constant 1.000000e+00 : f32
    %32 = vector.broadcast %cst_15 : f32 to vector<8x32xf32>
    %33 = arith.addf %32, %31 : vector<8x32xf32>
    %34 = arith.divf %32, %33 : vector<8x32xf32>
    %35 = arith.addf %22, %10 : vector<8x32xf32>
    %36 = arith.mulf %28, %35 : vector<8x32xf32>
    %37 = arith.addf %19, %36 : vector<8x32xf32>
    %38 = math.tanh %37 : vector<8x32xf32>
    %39 = arith.subf %11, %38 : vector<8x32xf32>
    %40 = arith.mulf %34, %39 : vector<8x32xf32>
    %41 = arith.addf %38, %40 : vector<8x32xf32>
    %42 = arith.index_cast %13 : i32 to index
    %c0_16 = arith.constant 0 : index
    %43 = vector.load %arg6[%42, %c0_16] : memref<80x32xf32, #tpu.memory_space<vmem>>, vector<8x32xf32>
    tpu.vector_store %arg6[%42, %c0_16], %41 {strides = array<i32>} : memref<80x32xf32, #tpu.memory_space<vmem>>, vector<8x32xf32>,
    %c1_i32 = arith.constant 1 : i32
    %c8_i32_17 = arith.constant 8 : i32
    %44 = arith.muli %c1_i32, %c8_i32_17 : i32
    %45 = tpu.assume_multiple %44, 8 : i32
    %46 = arith.index_cast %45 : i32 to index
    %c0_18 = arith.constant 0 : index
    %47 = vector.load %arg7[%46, %c0_18] : memref<80x96xf32, #tpu.memory_space<vmem>>, vector<8x96xf32>
    %cst_19 = arith.constant dense<0.000000e+00> : vector<8x96xf32>
    %48 = tpu.matmul %41, %7, %cst_19 {dimension_numbers = #tpu.dot_dimension_numbers<[1], [0], [0], [1], [0, 0, 1, 1], [], []>} : vector<8x32xf32>, vector<32x96xf32>, vector<8x96xf32> -> vector<8x96xf32>
    %49 = vector.extract_strided_slice %47 {offsets = [0, 0], sizes = [8, 32], strides = [1, 1]} : vector<8x96xf32> to vector<8x32xf32>
    %50 = vector.extract_strided_slice %47 {offsets = [0, 32], sizes = [8, 32], strides = [1, 1]} : vector<8x96xf32> to vector<8x32xf32>
    %51 = vector.extract_strided_slice %47 {offsets = [0, 64], sizes = [8, 32], strides = [1, 1]} : vector<8x96xf32> to vector<8x32xf32>
    %52 = vector.extract_strided_slice %48 {offsets = [0, 0], sizes = [8, 32], strides = [1, 1]} : vector<8x96xf32> to vector<8x32xf32>
    %53 = vector.extract_strided_slice %48 {offsets = [0, 32], sizes = [8, 32], strides = [1, 1]} : vector<8x96xf32> to vector<8x32xf32>
    %54 = vector.extract_strided_slice %48 {offsets = [0, 64], sizes = [8, 32], strides = [1, 1]} : vector<8x96xf32> to vector<8x32xf32>
    %55 = arith.addf %49, %52 : vector<8x32xf32>
    %56 = arith.negf %55 : vector<8x32xf32>
    %57 = math.exp %56 : vector<8x32xf32>
    %cst_20 = arith.constant 1.000000e+00 : f32
    %58 = vector.broadcast %cst_20 : f32 to vector<8x32xf32>
    %59 = arith.addf %58, %57 : vector<8x32xf32>
    %60 = arith.divf %58, %59 : vector<8x32xf32>
    %61 = arith.addf %50, %53 : vector<8x32xf32>
    %62 = arith.negf %61 : vector<8x32xf32>
    %63 = math.exp %62 : vector<8x32xf32>
    %cst_21 = arith.constant 1.000000e+00 : f32
    %64 = vector.broadcast %cst_21 : f32 to vector<8x32xf32>
    %65 = arith.addf %64, %63 : vector<8x32xf32>
    %66 = arith.divf %64, %65 : vector<8x32xf32>
    %67 = arith.addf %54, %10 : vector<8x32xf32>
    %68 = arith.mulf %60, %67 : vector<8x32xf32>
    %69 = arith.addf %51, %68 : vector<8x32xf32>
    %70 = math.tanh %69 : vector<8x32xf32>
    %71 = arith.subf %41, %70 : vector<8x32xf32>
    %72 = arith.mulf %66, %71 : vector<8x32xf32>
    %73 = arith.addf %70, %72 : vector<8x32xf32>
    %74 = arith.index_cast %45 : i32 to index
    %c0_22 = arith.constant 0 : index
    %75 = vector.load %arg6[%74, %c0_22] : memref<80x32xf32, #tpu.memory_space<vmem>>, vector<8x32xf32>
    tpu.vector_store %arg6[%74, %c0_22], %73 {strides = array<i32>} : memref<80x32xf32, #tpu.memory_space<vmem>>, vector<8x32xf32>,
    %c2_i32 = arith.constant 2 : i32
    %c8_i32_23 = arith.constant 8 : i32
    %76 = arith.muli %c2_i32, %c8_i32_23 : i32
    %77 = tpu.assume_multiple %76, 8 : i32
    %78 = arith.index_cast %77 : i32 to index
    %c0_24 = arith.constant 0 : index
    %79 = vector.load %arg7[%78, %c0_24] : memref<80x96xf32, #tpu.memory_space<vmem>>, vector<8x96xf32>
    %cst_25 = arith.constant dense<0.000000e+00> : vector<8x96xf32>
    %80 = tpu.matmul %73, %7, %cst_25 {dimension_numbers = #tpu.dot_dimension_numbers<[1], [0], [0], [1], [0, 0, 1, 1], [], []>} : vector<8x32xf32>, vector<32x96xf32>, vector<8x96xf32> -> vector<8x96xf32>
    %81 = vector.extract_strided_slice %79 {offsets = [0, 0], sizes = [8, 32], strides = [1, 1]} : vector<8x96xf32> to vector<8x32xf32>
    %82 = vector.extract_strided_slice %79 {offsets = [0, 32], sizes = [8, 32], strides = [1, 1]} : vector<8x96xf32> to vector<8x32xf32>
    %83 = vector.extract_strided_slice %79 {offsets = [0, 64], sizes = [8, 32], strides = [1, 1]} : vector<8x96xf32> to vector<8x32xf32>
    %84 = vector.extract_strided_slice %80 {offsets = [0, 0], sizes = [8, 32], strides = [1, 1]} : vector<8x96xf32> to vector<8x32xf32>
    %85 = vector.extract_strided_slice %80 {offsets = [0, 32], sizes = [8, 32], strides = [1, 1]} : vector<8x96xf32> to vector<8x32xf32>
    %86 = vector.extract_strided_slice %80 {offsets = [0, 64], sizes = [8, 32], strides = [1, 1]} : vector<8x96xf32> to vector<8x32xf32>
    %87 = arith.addf %81, %84 : vector<8x32xf32>
    %88 = arith.negf %87 : vector<8x32xf32>
    %89 = math.exp %88 : vector<8x32xf32>
    %cst_26 = arith.constant 1.000000e+00 : f32
    %90 = vector.broadcast %cst_26 : f32 to vector<8x32xf32>
    %91 = arith.addf %90, %89 : vector<8x32xf32>
    %92 = arith.divf %90, %91 : vector<8x32xf32>
    %93 = arith.addf %82, %85 : vector<8x32xf32>
    %94 = arith.negf %93 : vector<8x32xf32>
    %95 = math.exp %94 : vector<8x32xf32>
    %cst_27 = arith.constant 1.000000e+00 : f32
    %96 = vector.broadcast %cst_27 : f32 to vector<8x32xf32>
    %97 = arith.addf %96, %95 : vector<8x32xf32>
    %98 = arith.divf %96, %97 : vector<8x32xf32>
    %99 = arith.addf %86, %10 : vector<8x32xf32>
    %100 = arith.mulf %92, %99 : vector<8x32xf32>
    %101 = arith.addf %83, %100 : vector<8x32xf32>
    %102 = math.tanh %101 : vector<8x32xf32>
    %103 = arith.subf %73, %102 : vector<8x32xf32>
    %104 = arith.mulf %98, %103 : vector<8x32xf32>
    %105 = arith.addf %102, %104 : vector<8x32xf32>
    %106 = arith.index_cast %77 : i32 to index
    %c0_28 = arith.constant 0 : index
    %107 = vector.load %arg6[%106, %c0_28] : memref<80x32xf32, #tpu.memory_space<vmem>>, vector<8x32xf32>
    tpu.vector_store %arg6[%106, %c0_28], %105 {strides = array<i32>} : memref<80x32xf32, #tpu.memory_space<vmem>>, vector<8x32xf32>,
    %c3_i32 = arith.constant 3 : i32
    %c8_i32_29 = arith.constant 8 : i32
    %108 = arith.muli %c3_i32, %c8_i32_29 : i32
    %109 = tpu.assume_multiple %108, 8 : i32
    %110 = arith.index_cast %109 : i32 to index
    %c0_30 = arith.constant 0 : index
    %111 = vector.load %arg7[%110, %c0_30] : memref<80x96xf32, #tpu.memory_space<vmem>>, vector<8x96xf32>
    %cst_31 = arith.constant dense<0.000000e+00> : vector<8x96xf32>
    %112 = tpu.matmul %105, %7, %cst_31 {dimension_numbers = #tpu.dot_dimension_numbers<[1], [0], [0], [1], [0, 0, 1, 1], [], []>} : vector<8x32xf32>, vector<32x96xf32>, vector<8x96xf32> -> vector<8x96xf32>
    %113 = vector.extract_strided_slice %111 {offsets = [0, 0], sizes = [8, 32], strides = [1, 1]} : vector<8x96xf32> to vector<8x32xf32>
    %114 = vector.extract_strided_slice %111 {offsets = [0, 32], sizes = [8, 32], strides = [1, 1]} : vector<8x96xf32> to vector<8x32xf32>
    %115 = vector.extract_strided_slice %111 {offsets = [0, 64], sizes = [8, 32], strides = [1, 1]} : vector<8x96xf32> to vector<8x32xf32>
    %116 = vector.extract_strided_slice %112 {offsets = [0, 0], sizes = [8, 32], strides = [1, 1]} : vector<8x96xf32> to vector<8x32xf32>
    %117 = vector.extract_strided_slice %112 {offsets = [0, 32], sizes = [8, 32], strides = [1, 1]} : vector<8x96xf32> to vector<8x32xf32>
    %118 = vector.extract_strided_slice %112 {offsets = [0, 64], sizes = [8, 32], strides = [1, 1]} : vector<8x96xf32> to vector<8x32xf32>
    %119 = arith.addf %113, %116 : vector<8x32xf32>
    %120 = arith.negf %119 : vector<8x32xf32>
    %121 = math.exp %120 : vector<8x32xf32>
    %cst_32 = arith.constant 1.000000e+00 : f32
    %122 = vector.broadcast %cst_32 : f32 to vector<8x32xf32>
    %123 = arith.addf %122, %121 : vector<8x32xf32>
    %124 = arith.divf %122, %123 : vector<8x32xf32>
    %125 = arith.addf %114, %117 : vector<8x32xf32>
    %126 = arith.negf %125 : vector<8x32xf32>
    %127 = math.exp %126 : vector<8x32xf32>
    %cst_33 = arith.constant 1.000000e+00 : f32
    %128 = vector.broadcast %cst_33 : f32 to vector<8x32xf32>
    %129 = arith.addf %128, %127 : vector<8x32xf32>
    %130 = arith.divf %128, %129 : vector<8x32xf32>
    %131 = arith.addf %118, %10 : vector<8x32xf32>
    %132 = arith.mulf %124, %131 : vector<8x32xf32>
    %133 = arith.addf %115, %132 : vector<8x32xf32>
    %134 = math.tanh %133 : vector<8x32xf32>
    %135 = arith.subf %105, %134 : vector<8x32xf32>
    %136 = arith.mulf %130, %135 : vector<8x32xf32>
    %137 = arith.addf %134, %136 : vector<8x32xf32>
    %138 = arith.index_cast %109 : i32 to index
    %c0_34 = arith.constant 0 : index
    %139 = vector.load %arg6[%138, %c0_34] : memref<80x32xf32, #tpu.memory_space<vmem>>, vector<8x32xf32>
    tpu.vector_store %arg6[%138, %c0_34], %137 {strides = array<i32>} : memref<80x32xf32, #tpu.memory_space<vmem>>, vector<8x32xf32>,
    %c4_i32 = arith.constant 4 : i32
    %c8_i32_35 = arith.constant 8 : i32
    %140 = arith.muli %c4_i32, %c8_i32_35 : i32
    %141 = tpu.assume_multiple %140, 8 : i32
    %142 = arith.index_cast %141 : i32 to index
    %c0_36 = arith.constant 0 : index
    %143 = vector.load %arg7[%142, %c0_36] : memref<80x96xf32, #tpu.memory_space<vmem>>, vector<8x96xf32>
    %cst_37 = arith.constant dense<0.000000e+00> : vector<8x96xf32>
    %144 = tpu.matmul %137, %7, %cst_37 {dimension_numbers = #tpu.dot_dimension_numbers<[1], [0], [0], [1], [0, 0, 1, 1], [], []>} : vector<8x32xf32>, vector<32x96xf32>, vector<8x96xf32> -> vector<8x96xf32>
    %145 = vector.extract_strided_slice %143 {offsets = [0, 0], sizes = [8, 32], strides = [1, 1]} : vector<8x96xf32> to vector<8x32xf32>
    %146 = vector.extract_strided_slice %143 {offsets = [0, 32], sizes = [8, 32], strides = [1, 1]} : vector<8x96xf32> to vector<8x32xf32>
    %147 = vector.extract_strided_slice %143 {offsets = [0, 64], sizes = [8, 32], strides = [1, 1]} : vector<8x96xf32> to vector<8x32xf32>
    %148 = vector.extract_strided_slice %144 {offsets = [0, 0], sizes = [8, 32], strides = [1, 1]} : vector<8x96xf32> to vector<8x32xf32>
    %149 = vector.extract_strided_slice %144 {offsets = [0, 32], sizes = [8, 32], strides = [1, 1]} : vector<8x96xf32> to vector<8x32xf32>
    %150 = vector.extract_strided_slice %144 {offsets = [0, 64], sizes = [8, 32], strides = [1, 1]} : vector<8x96xf32> to vector<8x32xf32>
    %151 = arith.addf %145, %148 : vector<8x32xf32>
    %152 = arith.negf %151 : vector<8x32xf32>
    %153 = math.exp %152 : vector<8x32xf32>
    %cst_38 = arith.constant 1.000000e+00 : f32
    %154 = vector.broadcast %cst_38 : f32 to vector<8x32xf32>
    %155 = arith.addf %154, %153 : vector<8x32xf32>
    %156 = arith.divf %154, %155 : vector<8x32xf32>
    %157 = arith.addf %146, %149 : vector<8x32xf32>
    %158 = arith.negf %157 : vector<8x32xf32>
    %159 = math.exp %158 : vector<8x32xf32>
    %cst_39 = arith.constant 1.000000e+00 : f32
    %160 = vector.broadcast %cst_39 : f32 to vector<8x32xf32>
    %161 = arith.addf %160, %159 : vector<8x32xf32>
    %162 = arith.divf %160, %161 : vector<8x32xf32>
    %163 = arith.addf %150, %10 : vector<8x32xf32>
    %164 = arith.mulf %156, %163 : vector<8x32xf32>
    %165 = arith.addf %147, %164 : vector<8x32xf32>
    %166 = math.tanh %165 : vector<8x32xf32>
    %167 = arith.subf %137, %166 : vector<8x32xf32>
    %168 = arith.mulf %162, %167 : vector<8x32xf32>
    %169 = arith.addf %166, %168 : vector<8x32xf32>
    %170 = arith.index_cast %141 : i32 to index
    %c0_40 = arith.constant 0 : index
    %171 = vector.load %arg6[%170, %c0_40] : memref<80x32xf32, #tpu.memory_space<vmem>>, vector<8x32xf32>
    tpu.vector_store %arg6[%170, %c0_40], %169 {strides = array<i32>} : memref<80x32xf32, #tpu.memory_space<vmem>>, vector<8x32xf32>,
    %c5_i32 = arith.constant 5 : i32
    %c8_i32_41 = arith.constant 8 : i32
    %172 = arith.muli %c5_i32, %c8_i32_41 : i32
    %173 = tpu.assume_multiple %172, 8 : i32
    %174 = arith.index_cast %173 : i32 to index
    %c0_42 = arith.constant 0 : index
    %175 = vector.load %arg7[%174, %c0_42] : memref<80x96xf32, #tpu.memory_space<vmem>>, vector<8x96xf32>
    %cst_43 = arith.constant dense<0.000000e+00> : vector<8x96xf32>
    %176 = tpu.matmul %169, %7, %cst_43 {dimension_numbers = #tpu.dot_dimension_numbers<[1], [0], [0], [1], [0, 0, 1, 1], [], []>} : vector<8x32xf32>, vector<32x96xf32>, vector<8x96xf32> -> vector<8x96xf32>
    %177 = vector.extract_strided_slice %175 {offsets = [0, 0], sizes = [8, 32], strides = [1, 1]} : vector<8x96xf32> to vector<8x32xf32>
    %178 = vector.extract_strided_slice %175 {offsets = [0, 32], sizes = [8, 32], strides = [1, 1]} : vector<8x96xf32> to vector<8x32xf32>
    %179 = vector.extract_strided_slice %175 {offsets = [0, 64], sizes = [8, 32], strides = [1, 1]} : vector<8x96xf32> to vector<8x32xf32>
    %180 = vector.extract_strided_slice %176 {offsets = [0, 0], sizes = [8, 32], strides = [1, 1]} : vector<8x96xf32> to vector<8x32xf32>
    %181 = vector.extract_strided_slice %176 {offsets = [0, 32], sizes = [8, 32], strides = [1, 1]} : vector<8x96xf32> to vector<8x32xf32>
    %182 = vector.extract_strided_slice %176 {offsets = [0, 64], sizes = [8, 32], strides = [1, 1]} : vector<8x96xf32> to vector<8x32xf32>
    %183 = arith.addf %177, %180 : vector<8x32xf32>
    %184 = arith.negf %183 : vector<8x32xf32>
    %185 = math.exp %184 : vector<8x32xf32>
    %cst_44 = arith.constant 1.000000e+00 : f32
    %186 = vector.broadcast %cst_44 : f32 to vector<8x32xf32>
    %187 = arith.addf %186, %185 : vector<8x32xf32>
    %188 = arith.divf %186, %187 : vector<8x32xf32>
    %189 = arith.addf %178, %181 : vector<8x32xf32>
    %190 = arith.negf %189 : vector<8x32xf32>
    %191 = math.exp %190 : vector<8x32xf32>
    %cst_45 = arith.constant 1.000000e+00 : f32
    %192 = vector.broadcast %cst_45 : f32 to vector<8x32xf32>
    %193 = arith.addf %192, %191 : vector<8x32xf32>
    %194 = arith.divf %192, %193 : vector<8x32xf32>
    %195 = arith.addf %182, %10 : vector<8x32xf32>
    %196 = arith.mulf %188, %195 : vector<8x32xf32>
    %197 = arith.addf %179, %196 : vector<8x32xf32>
    %198 = math.tanh %197 : vector<8x32xf32>
    %199 = arith.subf %169, %198 : vector<8x32xf32>
    %200 = arith.mulf %194, %199 : vector<8x32xf32>
    %201 = arith.addf %198, %200 : vector<8x32xf32>
    %202 = arith.index_cast %173 : i32 to index
    %c0_46 = arith.constant 0 : index
    %203 = vector.load %arg6[%202, %c0_46] : memref<80x32xf32, #tpu.memory_space<vmem>>, vector<8x32xf32>
    tpu.vector_store %arg6[%202, %c0_46], %201 {strides = array<i32>} : memref<80x32xf32, #tpu.memory_space<vmem>>, vector<8x32xf32>,
    %c6_i32 = arith.constant 6 : i32
    %c8_i32_47 = arith.constant 8 : i32
    %204 = arith.muli %c6_i32, %c8_i32_47 : i32
    %205 = tpu.assume_multiple %204, 8 : i32
    %206 = arith.index_cast %205 : i32 to index
    %c0_48 = arith.constant 0 : index
    %207 = vector.load %arg7[%206, %c0_48] : memref<80x96xf32, #tpu.memory_space<vmem>>, vector<8x96xf32>
    %cst_49 = arith.constant dense<0.000000e+00> : vector<8x96xf32>
    %208 = tpu.matmul %201, %7, %cst_49 {dimension_numbers = #tpu.dot_dimension_numbers<[1], [0], [0], [1], [0, 0, 1, 1], [], []>} : vector<8x32xf32>, vector<32x96xf32>, vector<8x96xf32> -> vector<8x96xf32>
    %209 = vector.extract_strided_slice %207 {offsets = [0, 0], sizes = [8, 32], strides = [1, 1]} : vector<8x96xf32> to vector<8x32xf32>
    %210 = vector.extract_strided_slice %207 {offsets = [0, 32], sizes = [8, 32], strides = [1, 1]} : vector<8x96xf32> to vector<8x32xf32>
    %211 = vector.extract_strided_slice %207 {offsets = [0, 64], sizes = [8, 32], strides = [1, 1]} : vector<8x96xf32> to vector<8x32xf32>
    %212 = vector.extract_strided_slice %208 {offsets = [0, 0], sizes = [8, 32], strides = [1, 1]} : vector<8x96xf32> to vector<8x32xf32>
    %213 = vector.extract_strided_slice %208 {offsets = [0, 32], sizes = [8, 32], strides = [1, 1]} : vector<8x96xf32> to vector<8x32xf32>
    %214 = vector.extract_strided_slice %208 {offsets = [0, 64], sizes = [8, 32], strides = [1, 1]} : vector<8x96xf32> to vector<8x32xf32>
    %215 = arith.addf %209, %212 : vector<8x32xf32>
    %216 = arith.negf %215 : vector<8x32xf32>
    %217 = math.exp %216 : vector<8x32xf32>
    %cst_50 = arith.constant 1.000000e+00 : f32
    %218 = vector.broadcast %cst_50 : f32 to vector<8x32xf32>
    %219 = arith.addf %218, %217 : vector<8x32xf32>
    %220 = arith.divf %218, %219 : vector<8x32xf32>
    %221 = arith.addf %210, %213 : vector<8x32xf32>
    %222 = arith.negf %221 : vector<8x32xf32>
    %223 = math.exp %222 : vector<8x32xf32>
    %cst_51 = arith.constant 1.000000e+00 : f32
    %224 = vector.broadcast %cst_51 : f32 to vector<8x32xf32>
    %225 = arith.addf %224, %223 : vector<8x32xf32>
    %226 = arith.divf %224, %225 : vector<8x32xf32>
    %227 = arith.addf %214, %10 : vector<8x32xf32>
    %228 = arith.mulf %220, %227 : vector<8x32xf32>
    %229 = arith.addf %211, %228 : vector<8x32xf32>
    %230 = math.tanh %229 : vector<8x32xf32>
    %231 = arith.subf %201, %230 : vector<8x32xf32>
    %232 = arith.mulf %226, %231 : vector<8x32xf32>
    %233 = arith.addf %230, %232 : vector<8x32xf32>
    %234 = arith.index_cast %205 : i32 to index
    %c0_52 = arith.constant 0 : index
    %235 = vector.load %arg6[%234, %c0_52] : memref<80x32xf32, #tpu.memory_space<vmem>>, vector<8x32xf32>
    tpu.vector_store %arg6[%234, %c0_52], %233 {strides = array<i32>} : memref<80x32xf32, #tpu.memory_space<vmem>>, vector<8x32xf32>,
    %c7_i32 = arith.constant 7 : i32
    %c8_i32_53 = arith.constant 8 : i32
    %236 = arith.muli %c7_i32, %c8_i32_53 : i32
    %237 = tpu.assume_multiple %236, 8 : i32
    %238 = arith.index_cast %237 : i32 to index
    %c0_54 = arith.constant 0 : index
    %239 = vector.load %arg7[%238, %c0_54] : memref<80x96xf32, #tpu.memory_space<vmem>>, vector<8x96xf32>
    %cst_55 = arith.constant dense<0.000000e+00> : vector<8x96xf32>
    %240 = tpu.matmul %233, %7, %cst_55 {dimension_numbers = #tpu.dot_dimension_numbers<[1], [0], [0], [1], [0, 0, 1, 1], [], []>} : vector<8x32xf32>, vector<32x96xf32>, vector<8x96xf32> -> vector<8x96xf32>
    %241 = vector.extract_strided_slice %239 {offsets = [0, 0], sizes = [8, 32], strides = [1, 1]} : vector<8x96xf32> to vector<8x32xf32>
    %242 = vector.extract_strided_slice %239 {offsets = [0, 32], sizes = [8, 32], strides = [1, 1]} : vector<8x96xf32> to vector<8x32xf32>
    %243 = vector.extract_strided_slice %239 {offsets = [0, 64], sizes = [8, 32], strides = [1, 1]} : vector<8x96xf32> to vector<8x32xf32>
    %244 = vector.extract_strided_slice %240 {offsets = [0, 0], sizes = [8, 32], strides = [1, 1]} : vector<8x96xf32> to vector<8x32xf32>
    %245 = vector.extract_strided_slice %240 {offsets = [0, 32], sizes = [8, 32], strides = [1, 1]} : vector<8x96xf32> to vector<8x32xf32>
    %246 = vector.extract_strided_slice %240 {offsets = [0, 64], sizes = [8, 32], strides = [1, 1]} : vector<8x96xf32> to vector<8x32xf32>
    %247 = arith.addf %241, %244 : vector<8x32xf32>
    %248 = arith.negf %247 : vector<8x32xf32>
    %249 = math.exp %248 : vector<8x32xf32>
    %cst_56 = arith.constant 1.000000e+00 : f32
    %250 = vector.broadcast %cst_56 : f32 to vector<8x32xf32>
    %251 = arith.addf %250, %249 : vector<8x32xf32>
    %252 = arith.divf %250, %251 : vector<8x32xf32>
    %253 = arith.addf %242, %245 : vector<8x32xf32>
    %254 = arith.negf %253 : vector<8x32xf32>
    %255 = math.exp %254 : vector<8x32xf32>
    %cst_57 = arith.constant 1.000000e+00 : f32
    %256 = vector.broadcast %cst_57 : f32 to vector<8x32xf32>
    %257 = arith.addf %256, %255 : vector<8x32xf32>
    %258 = arith.divf %256, %257 : vector<8x32xf32>
    %259 = arith.addf %246, %10 : vector<8x32xf32>
    %260 = arith.mulf %252, %259 : vector<8x32xf32>
    %261 = arith.addf %243, %260 : vector<8x32xf32>
    %262 = math.tanh %261 : vector<8x32xf32>
    %263 = arith.subf %233, %262 : vector<8x32xf32>
    %264 = arith.mulf %258, %263 : vector<8x32xf32>
    %265 = arith.addf %262, %264 : vector<8x32xf32>
    %266 = arith.index_cast %237 : i32 to index
    %c0_58 = arith.constant 0 : index
    %267 = vector.load %arg6[%266, %c0_58] : memref<80x32xf32, #tpu.memory_space<vmem>>, vector<8x32xf32>
    tpu.vector_store %arg6[%266, %c0_58], %265 {strides = array<i32>} : memref<80x32xf32, #tpu.memory_space<vmem>>, vector<8x32xf32>,
    %c8_i32_59 = arith.constant 8 : i32
    %c8_i32_60 = arith.constant 8 : i32
    %268 = arith.muli %c8_i32_59, %c8_i32_60 : i32
    %269 = tpu.assume_multiple %268, 8 : i32
    %270 = arith.index_cast %269 : i32 to index
    %c0_61 = arith.constant 0 : index
    %271 = vector.load %arg7[%270, %c0_61] : memref<80x96xf32, #tpu.memory_space<vmem>>, vector<8x96xf32>
    %cst_62 = arith.constant dense<0.000000e+00> : vector<8x96xf32>
    %272 = tpu.matmul %265, %7, %cst_62 {dimension_numbers = #tpu.dot_dimension_numbers<[1], [0], [0], [1], [0, 0, 1, 1], [], []>} : vector<8x32xf32>, vector<32x96xf32>, vector<8x96xf32> -> vector<8x96xf32>
    %273 = vector.extract_strided_slice %271 {offsets = [0, 0], sizes = [8, 32], strides = [1, 1]} : vector<8x96xf32> to vector<8x32xf32>
    %274 = vector.extract_strided_slice %271 {offsets = [0, 32], sizes = [8, 32], strides = [1, 1]} : vector<8x96xf32> to vector<8x32xf32>
    %275 = vector.extract_strided_slice %271 {offsets = [0, 64], sizes = [8, 32], strides = [1, 1]} : vector<8x96xf32> to vector<8x32xf32>
    %276 = vector.extract_strided_slice %272 {offsets = [0, 0], sizes = [8, 32], strides = [1, 1]} : vector<8x96xf32> to vector<8x32xf32>
    %277 = vector.extract_strided_slice %272 {offsets = [0, 32], sizes = [8, 32], strides = [1, 1]} : vector<8x96xf32> to vector<8x32xf32>
    %278 = vector.extract_strided_slice %272 {offsets = [0, 64], sizes = [8, 32], strides = [1, 1]} : vector<8x96xf32> to vector<8x32xf32>
    %279 = arith.addf %273, %276 : vector<8x32xf32>
    %280 = arith.negf %279 : vector<8x32xf32>
    %281 = math.exp %280 : vector<8x32xf32>
    %cst_63 = arith.constant 1.000000e+00 : f32
    %282 = vector.broadcast %cst_63 : f32 to vector<8x32xf32>
    %283 = arith.addf %282, %281 : vector<8x32xf32>
    %284 = arith.divf %282, %283 : vector<8x32xf32>
    %285 = arith.addf %274, %277 : vector<8x32xf32>
    %286 = arith.negf %285 : vector<8x32xf32>
    %287 = math.exp %286 : vector<8x32xf32>
    %cst_64 = arith.constant 1.000000e+00 : f32
    %288 = vector.broadcast %cst_64 : f32 to vector<8x32xf32>
    %289 = arith.addf %288, %287 : vector<8x32xf32>
    %290 = arith.divf %288, %289 : vector<8x32xf32>
    %291 = arith.addf %278, %10 : vector<8x32xf32>
    %292 = arith.mulf %284, %291 : vector<8x32xf32>
    %293 = arith.addf %275, %292 : vector<8x32xf32>
    %294 = math.tanh %293 : vector<8x32xf32>
    %295 = arith.subf %265, %294 : vector<8x32xf32>
    %296 = arith.mulf %290, %295 : vector<8x32xf32>
    %297 = arith.addf %294, %296 : vector<8x32xf32>
    %298 = arith.index_cast %269 : i32 to index
    %c0_65 = arith.constant 0 : index
    %299 = vector.load %arg6[%298, %c0_65] : memref<80x32xf32, #tpu.memory_space<vmem>>, vector<8x32xf32>
    tpu.vector_store %arg6[%298, %c0_65], %297 {strides = array<i32>} : memref<80x32xf32, #tpu.memory_space<vmem>>, vector<8x32xf32>,
    %c9_i32 = arith.constant 9 : i32
    %c8_i32_66 = arith.constant 8 : i32
    %300 = arith.muli %c9_i32, %c8_i32_66 : i32
    %301 = tpu.assume_multiple %300, 8 : i32
    %302 = arith.index_cast %301 : i32 to index
    %c0_67 = arith.constant 0 : index
    %303 = vector.load %arg7[%302, %c0_67] : memref<80x96xf32, #tpu.memory_space<vmem>>, vector<8x96xf32>
    %cst_68 = arith.constant dense<0.000000e+00> : vector<8x96xf32>
    %304 = tpu.matmul %297, %7, %cst_68 {dimension_numbers = #tpu.dot_dimension_numbers<[1], [0], [0], [1], [0, 0, 1, 1], [], []>} : vector<8x32xf32>, vector<32x96xf32>, vector<8x96xf32> -> vector<8x96xf32>
    %305 = vector.extract_strided_slice %303 {offsets = [0, 0], sizes = [8, 32], strides = [1, 1]} : vector<8x96xf32> to vector<8x32xf32>
    %306 = vector.extract_strided_slice %303 {offsets = [0, 32], sizes = [8, 32], strides = [1, 1]} : vector<8x96xf32> to vector<8x32xf32>
    %307 = vector.extract_strided_slice %303 {offsets = [0, 64], sizes = [8, 32], strides = [1, 1]} : vector<8x96xf32> to vector<8x32xf32>
    %308 = vector.extract_strided_slice %304 {offsets = [0, 0], sizes = [8, 32], strides = [1, 1]} : vector<8x96xf32> to vector<8x32xf32>
    %309 = vector.extract_strided_slice %304 {offsets = [0, 32], sizes = [8, 32], strides = [1, 1]} : vector<8x96xf32> to vector<8x32xf32>
    %310 = vector.extract_strided_slice %304 {offsets = [0, 64], sizes = [8, 32], strides = [1, 1]} : vector<8x96xf32> to vector<8x32xf32>
    %311 = arith.addf %305, %308 : vector<8x32xf32>
    %312 = arith.negf %311 : vector<8x32xf32>
    %313 = math.exp %312 : vector<8x32xf32>
    %cst_69 = arith.constant 1.000000e+00 : f32
    %314 = vector.broadcast %cst_69 : f32 to vector<8x32xf32>
    %315 = arith.addf %314, %313 : vector<8x32xf32>
    %316 = arith.divf %314, %315 : vector<8x32xf32>
    %317 = arith.addf %306, %309 : vector<8x32xf32>
    %318 = arith.negf %317 : vector<8x32xf32>
    %319 = math.exp %318 : vector<8x32xf32>
    %cst_70 = arith.constant 1.000000e+00 : f32
    %320 = vector.broadcast %cst_70 : f32 to vector<8x32xf32>
    %321 = arith.addf %320, %319 : vector<8x32xf32>
    %322 = arith.divf %320, %321 : vector<8x32xf32>
    %323 = arith.addf %310, %10 : vector<8x32xf32>
    %324 = arith.mulf %316, %323 : vector<8x32xf32>
    %325 = arith.addf %307, %324 : vector<8x32xf32>
    %326 = math.tanh %325 : vector<8x32xf32>
    %327 = arith.subf %297, %326 : vector<8x32xf32>
    %328 = arith.mulf %322, %327 : vector<8x32xf32>
    %329 = arith.addf %326, %328 : vector<8x32xf32>
    %330 = arith.index_cast %301 : i32 to index
    %c0_71 = arith.constant 0 : index
    %331 = vector.load %arg6[%330, %c0_71] : memref<80x32xf32, #tpu.memory_space<vmem>>, vector<8x32xf32>
    tpu.vector_store %arg6[%330, %c0_71], %329 {strides = array<i32>} : memref<80x32xf32, #tpu.memory_space<vmem>>, vector<8x32xf32>,
    %c10_i32 = arith.constant 10 : i32
    return
  }
  func.func @transform_0(%arg0: i32) -> (i32, i32) {
    %c0_i32 = arith.constant 0 : i32
    %c0_i32_0 = arith.constant 0 : i32
    %c0_i32_1 = arith.constant 0 : i32
    return %c0_i32, %c0_i32_0 : i32, i32
  }
  func.func @transform_1(%arg0: i32) -> (i32, i32) {
    %c0_i32 = arith.constant 0 : i32
    %c0_i32_0 = arith.constant 0 : i32
    %c0_i32_1 = arith.constant 0 : i32
    return %c0_i32, %c0_i32_0 : i32, i32
  }
  func.func @transform_2(%arg0: i32) -> (i32, i32) {
    %c0_i32 = arith.constant 0 : i32
    %c0_i32_0 = arith.constant 0 : i32
    %c0_i32_1 = arith.constant 0 : i32
    return %c0_i32, %c0_i32_0 : i32, i32
  }
  func.func @transform_3(%arg0: i32) -> (i32, i32) {
    %c0_i32 = arith.constant 0 : i32
    %c0_i32_0 = arith.constant 0 : i32
    %c0_i32_1 = arith.constant 0 : i32
    return %c0_i32, %c0_i32_0 : i32, i32
  }
  func.func @transform_4(%arg0: i32) -> (i32, i32) {
    %c0_i32 = arith.constant 0 : i32
    %c0_i32_0 = arith.constant 0 : i32
    %c0_i32_1 = arith.constant 0 : i32
    return %c0_i32, %c0_i32_0 : i32, i32
  }
  func.func @transform_5(%arg0: i32) -> (i32, i32) {
    %c0_i32 = arith.constant 0 : i32
    %c0_i32_0 = arith.constant 0 : i32
    %c0_i32_1 = arith.constant 0 : i32
    return %c0_i32, %c0_i32_0 : i32, i32
  }
}

</mosaic_0001>

<bundles_post_ra>
// kernel: tpu_custom_call.1
= control target key start
LH: loop header
LB: loop body
LE: loop exit
PB: predicated region body
PF: predicated region fallthrough
CT: control target
= control target key end

     0   :  { %v1685_v0 = vmov 0.0|0.0   ;;  %vm1686_vm0 = vmmov 0   ;;  %v1687_v4 = vmov 0.0   ;;  %vm41_vm1 = vcmask 261120   ;;  %s1690_s15 = smov 32   ;;  %s1990_s1 = inlined_call_operand.vmem [shape: f32[32,96], index: 1, kind: input, shape index: {}]   ;;  %s1991_s2 = inlined_call_operand.vmem [shape: f32[32,96], index: 2, kind: input, shape index: {}]   ;;  %s1992_s0 = inlined_call_operand.vmem [shape: f32[80,32], index: 0, kind: input, shape index: {}]   ;;  %s1993_s4 = inlined_call_operand.vmem [shape: f32[1,32], index: 4, kind: input, shape index: {}]   ;;  %s1994_s3 = inlined_call_operand.vmem [shape: f32[1,96], index: 3, kind: input, shape index: {}]   ;;  %s1995_s5 = inlined_call_operand.vmem [shape: f32[80,32], index: 5, kind: output, shape index: {}]  }
   0x1   :  { %1559 = vmatprep.subr.bf16.mxu1 %v1685_v0  ;;  %v30_v1 = vld [vmem:[%s1990_s1] sm:$0xff]  ;;  %v31_v2 = vld [vmem:[%s1990_s1 + $0x8] sm:$0xff]  ;;  %1449 = vmatprep.mubr.msk.f32.mxu1 %vm1686_vm0, %v1687_v4  ;;  %v32_v7 = vld [vmem:[%s1990_s1 + $0x10] sm:$0xff]  ;;  %vm187_vm2 = vcmask 785408  }
   0x2   :  { %v198_v3 = vld [vmem:[%s1991_s2] sm:$0xff]  ;;  %v1551_v5 = vpack.c.bf16 %v31_v2, %v30_v1  ;;  %v199_v6 = vld [vmem:[%s1991_s2 + $0x8] sm:$0xff]  ;;  %v33_v8 = vld [vmem:[%s1990_s1 + $0x18] sm:$0xff] }
   0x3   :  { %v1742_v9 = vpack.c.bf16 %v199_v6, %v198_v3  ;;  %v1555_v10 = vpack.c.bf16 %v33_v8, %v32_v7  ;;  %v200_v11 = vld [vmem:[%s1991_s2 + $0x10] sm:$0xff]  ;;  %v201_v12 = vld [vmem:[%s1991_s2 + $0x18] sm:$0xff]  ;;  %v20_v13 = vld [vmem:[%s1992_s0] sm:$0xff]  ;;  %s1688_s2 = smov 64  }
   0x4   :  { %1552 = vmatprep.subr.bf16.mxu0 %v1551_v5  ;;  %1426 = vmatprep.mubr.msk.f32.mxu0 %vm41_vm1, %v20_v13  ;;  %v1325_v14 = vld [vmem:[%s1993_s4] ss:$0 sm:$0xff]  ;;  %v1758_v15 = vpack.c.bf16 %v201_v12, %v200_v11  ;;  %v21_v16 = vld [vmem:[%s1992_s0 + $0x8] sm:$0xff]  ;;  %v22_v58 = vld [vmem:[%s1992_s0 + $0x10] sm:$0xff] }
   0x5   :  { %1561 = vmatpush3.bf16.msra.mxu1 %v1742_v9  ;;  %1554 = vmatpush3.bf16.msra.mxu0 %v1551_v5  ;;  %v1785_v18 = vld [vmem:[%s1994_s3] ss:$0 sm:$0xff]  ;;  %s1689_s3 = smov 96   ;;  %v23_v59 = vld [vmem:[%s1992_s0 + $0x18] sm:$0xff] }
   0x6   :  { %1562 = vmatprep.subr.bf16.mxu1 %v1685_v0  ;;  %1556 = vmatprep.subr.bf16.mxu0 %v1555_v10 }
   0x7   :  { %289 = vrot.lane.b32.xlu0 %v1325_v14, %s1688_s2 }
   0x9   :  { %1564 = vmatpush3.bf16.msra.mxu1 %v1758_v15  ;;  %1558 = vmatpush3.bf16.msra.mxu0 %v1555_v10 }
   0xa   :  { %1565 = vmatprep.subr.bf16.mxu1 %v1685_v0  ;;  %1577 = vmatprep.subr.bf16.mxu0 %v1685_v0 }
   0xc   :  { %1450 = vmatmul.mubr.f32.vlgmr.msra.gmra.mrb[0].mxu1 %v1687_v4  ;;  %1427 = vmatmul.mubr.msk.f32.vlgmr.msra.gmra.mrb[0].mxu0 %vm41_vm1, %v21_v16 }
   0xd   :  { %1567 = vmatpush3.bf16.msra.mxu1 %v1742_v9  ;;  %1460 = vmatprep.mubr.msk.f32.mxu1 %vm1686_vm0, %v1687_v4 }
   0xe   :  { %1568 = vmatprep.subr.bf16.mxu1 %v1685_v0  ;;  %1579 = vmatpush3.bf16.msra.mxu0 %v1742_v9 }
   0xf   :  { %1580 = vmatprep.subr.bf16.mxu0 %v1685_v0  ;;  %1429 = vmatprep.mubr.msk.f32.mxu0 %vm41_vm1, %v22_v58 }
  0x10   :  { %1430 = vmatmul.mubr.msk.f32.gmra.mrb[2].mxu0 %vm41_vm1, %v23_v59 }
  0x11   :  { %1570 = vmatpush3.bf16.msra.mxu1 %v1758_v15 }
  0x12   :  { %1571 = vmatprep.subr.bf16.mxu1 %v1685_v0  ;;  %1582 = vmatpush3.bf16.msra.mxu0 %v1758_v15 }
  0x13   :  { %1589 = vmatprep.subr.bf16.mxu0 %v1685_v0 }
  0x79   :  { %v1780_v17 = vpop.permute.xlu0 %289 }
  0xdf   :  { %v278_v19 = vpop.f32.mrb[0].mxu1  ;;  %v1428_v20 = vpop.f32.mrb[0].mxu0 }
  0xe0   :  { %v292_v21 = vadd.f32 %v1780_v17, %v278_v19  ;;  %v144_v22 = vadd.f32 %v1428_v20, %v1785_v18  ;;  %v1451_v23 = vpop.f32.mrb[1].mxu1  ;;  %v138_v24 = vpop.f32.mrb[1].mxu0 }
  0xe1   :  { %v139_v25 = vadd.f32 %v1785_v18, %v138_v24 }
  0xe2   :  { %189 = vst.msk [vmem:[#allocation2 + $0x8] sm:$0xff] %vm187_vm2, %v144_v22  ;;  %294 = vrot.lane.b32.xlu0 %v292_v21, %s1688_s2 }
  0xe3   :  { %188 = vst.msk [vmem:[#allocation2] sm:$0xff] %vm187_vm2, %v139_v25  ;;  %v1431_v1 = vpop.f32.mrb[2].mxu0 }
  0xe4   :  { %v154_v2 = vadd.f32 %v1431_v1, %v1785_v18  ;;  %v148_v3 = vpop.f32.mrb[3].mxu0 }
  0xe5   :  { %v149_v5 = vadd.f32 %v1785_v18, %v148_v3 }
  0xe6   :  { %191 = vst.msk [vmem:[#allocation2 + $0x18] sm:$0xff] %vm187_vm2, %v154_v2 }
  0xe7   :  { %190 = vst.msk [vmem:[#allocation2 + $0x10] sm:$0xff] %vm187_vm2, %v149_v5 }
  0xe9   :  { %v321_v46 = vld [vmem:[#allocation2 + $0x8] sm:$0xff] }
  0xea   :  { %v208_v26 = vld [vmem:[#allocation2] sm:$0xff] }
  0xeb   :  { %v282_v27 = vadd.f32 %v278_v19, %v208_v26 }
  0xed   :  { %v1326_v28 = vmul.f32 -1.442695, %v282_v27  ;;  %v25_v27 = vld [vmem:[%s1992_s0 + $0x28] sm:$0xff] }
  0xee   :  { %v431_v11 = vld [vmem:[#allocation2 + $0x10] sm:$0xff] }
  0xef   :  { %1625 = vpow2.f32 %v1326_v28  ;;  %v26_v28 = vld [vmem:[%s1992_s0 + $0x30] sm:$0xff] }
  0xf9   :  { %v1626_v29 = vpop.eup %1625 }
  0xfa   :  { %v286_v30 = vadd.f32 1.0, %v1626_v29  ;;  %v27_v29 = vld [vmem:[%s1992_s0 + $0x38] sm:$0xff] }
  0xfc   :  { %1627 = vrcp.f32 %v286_v30  ;;  %v28_v30 = vld [vmem:[%s1992_s0 + $0x40] sm:$0xff] }
 0x106   :  { %v1628_v31 = vpop.eup %1627 }
 0x154   :  { %v295_v32 = vpop.permute.xlu0 %294 }
 0x155   :  { %v297_v33 = vmul.f32 %v1628_v31, %v295_v32 }
 0x157   :  { %299 = vrot.lane.b32.xlu1 %v297_v33, %s1688_s2 }
 0x1c9   :  { %v300_v34 = vpop.permute.xlu1 %299 }
 0x1ca   :  { %v302_v35 = vadd.f32 %v300_v34, %v208_v26  ;;  %v24_v26 = vld [vmem:[%s1992_s0 + $0x20] sm:$0xff] }
 0x1cb   :  { %1432 = vmatprep.mubr.msk.f32.mxu0 %vm41_vm1, %v24_v26 }
 0x1cc   :  { %1629 = vtanh.f32 %v302_v35  ;;  %1433 = vmatmul.mubr.msk.f32.gmra.mrb[4].mxu0 %vm41_vm1, %v25_v27 }
 0x1cd   :  { %1435 = vmatprep.mubr.msk.f32.mxu0 %vm41_vm1, %v26_v28 }
 0x1d0   :  { %1436 = vmatmul.mubr.msk.f32.gmra.mrb[6].mxu0 %vm41_vm1, %v27_v29 }
 0x1d1   :  { %1438 = vmatprep.mubr.msk.f32.mxu0 %vm41_vm1, %v28_v30 }
 0x1d6   :  { %v1630_v36 = vpop.eup %1629 }
 0x1d7   :  { %v304_v37 = vsub.f32 0.0, %v1630_v36 }
 0x1d9   :  { %306 = vrot.lane.b32.xlu1 %v304_v37, %s1689_s3 }
 0x24b   :  { %v307_v38 = vpop.permute.xlu1 %306 }
 0x24c   :  { %v309_v39 = vmul.f32 %v1628_v31, %v307_v38  ;;  %v29_v31 = vld [vmem:[%s1992_s0 + $0x48] sm:$0xff] }
 0x24d   :  { %1439 = vmatmul.mubr.msk.f32.gmra.mrb[8].mxu0 %vm41_vm1, %v29_v31 }
 0x24e   :  { %311 = vrot.lane.b32.xlu0 %v309_v39, %s1690_s15  ;;  %1482 = vmatprep.mubr.msk.f32.mxu0 %vm1686_vm0, %v1687_v4 }
 0x2c0   :  { %v312_v40 = vpop.permute.xlu0 %311 }
 0x2c1   :  { %v314_v41 = vadd.f32 %v1630_v36, %v312_v40  ;;  %v1434_v36 = vpop.f32.mrb[4].mxu0 }
 0x2c2   :  { %v164_v37 = vadd.f32 %v1434_v36, %v1785_v18  ;;  %v158_v38 = vpop.f32.mrb[5].mxu0 }
 0x2c3   :  { %316 = vrot.lane.b32.xlu1 %v314_v41, %s1688_s2  ;;  %v159_v39 = vadd.f32 %v1785_v18, %v158_v38  ;;  %v1437_v40 = vpop.f32.mrb[6].mxu0 }
 0x2c4   :  { %193 = vst.msk [vmem:[#allocation2 + $0x28] sm:$0xff] %vm187_vm2, %v164_v37 }
 0x2c5   :  { %192 = vst.msk [vmem:[#allocation2 + $0x20] sm:$0xff] %vm187_vm2, %v159_v39 }
 0x335   :  { %v317_v42 = vpop.permute.xlu1 %316 }
 0x336   :  { %319 = vst.msk [vmem:[%s1995_s5] sm:$0xff] %vm41_vm1, %v317_v42  ;;  %1461 = vmatmul.mubr.msk.f32.vlgmr.msra.gmra.mrb[2].mxu1 %vm41_vm1, %v317_v42  ;;  %v168_v42 = vpop.f32.mrb[7].mxu0 }
 0x337   :  { %1573 = vmatpush3.bf16.msra.mxu1 %v1742_v9  ;;  %1471 = vmatprep.mubr.msk.f32.mxu1 %vm1686_vm0, %v1687_v4 }
 0x338   :  { %1574 = vmatprep.subr.bf16.mxu1 %v1685_v0 }
 0x33b   :  { %1576 = vmatpush3.bf16.msra.mxu1 %v1758_v15 }
 0x33c   :  { %1583 = vmatprep.subr.bf16.mxu1 %v1685_v0 }
 0x409   :  { %v390_v43 = vpop.f32.mrb[2].mxu1 }
 0x40a   :  { %v401_v44 = vadd.f32 %v390_v43, %v1780_v17  ;;  %v1462_v45 = vpop.f32.mrb[3].mxu1  ;;  %v394_v47 = vadd.f32 %v390_v43, %v321_v46  ;;  %v169_v43 = vadd.f32 %v1785_v18, %v168_v42 }
 0x40c   :  { %403 = vrot.lane.b32.xlu0 %v401_v44, %s1688_s2  ;;  %v1328_v48 = vmul.f32 -1.442695, %v394_v47  ;;  %194 = vst.msk [vmem:[#allocation2 + $0x30] sm:$0xff] %vm187_vm2, %v169_v43  ;;  %v1440_v44 = vpop.f32.mrb[8].mxu0 }
 0x40d   :  { %v184_v45 = vadd.f32 %v1440_v44, %v1785_v18 }
 0x40e   :  { %1631 = vpow2.f32 %v1328_v48 }
 0x40f   :  { %197 = vst.msk [vmem:[#allocation2 + $0x48] sm:$0xff] %vm187_vm2, %v184_v45 }
 0x418   :  { %v1632_v49 = vpop.eup %1631 }
 0x419   :  { %v398_v50 = vadd.f32 1.0, %v1632_v49 }
 0x41b   :  { %1633 = vrcp.f32 %v398_v50 }
 0x425   :  { %v1634_v51 = vpop.eup %1633 }
 0x47e   :  { %v404_v52 = vpop.permute.xlu0 %403 }
 0x47f   :  { %v406_v53 = vmul.f32 %v1634_v51, %v404_v52 }
 0x481   :  { %408 = vrot.lane.b32.xlu1 %v406_v53, %s1688_s2 }
 0x4f3   :  { %v409_v54 = vpop.permute.xlu1 %408 }
 0x4f4   :  { %v411_v55 = vadd.f32 %v409_v54, %v321_v46  ;;  %v178_v46 = vpop.f32.mrb[9].mxu0 }
 0x4f5   :  { %v179_v47 = vadd.f32 %v1785_v18, %v178_v46 }
 0x4f6   :  { %1635 = vtanh.f32 %v411_v55 }
 0x4f7   :  { %196 = vst.msk [vmem:[#allocation2 + $0x40] sm:$0xff] %vm187_vm2, %v179_v47 }
 0x500   :  { %v1636_v56 = vpop.eup %1635 }
 0x501   :  { %v413_v57 = vsub.f32 %v314_v41, %v1636_v56  ;;  %v174_v41 = vadd.f32 %v1437_v40, %v1785_v18 }
 0x503   :  { %415 = vrot.lane.b32.xlu0 %v413_v57, %s1689_s3  ;;  %195 = vst.msk [vmem:[#allocation2 + $0x38] sm:$0xff] %vm187_vm2, %v174_v41 }
 0x575   :  { %v416_v60 = vpop.permute.xlu0 %415 }
 0x576   :  { %v418_v61 = vmul.f32 %v1634_v51, %v416_v60  ;;  %v541_v51 = vld [vmem:[#allocation2 + $0x18] sm:$0xff] }
 0x578   :  { %420 = vrot.lane.b32.xlu1 %v418_v61, %s1690_s15 }
 0x5ea   :  { %v421_v62 = vpop.permute.xlu1 %420 }
 0x5eb   :  { %v423_v63 = vadd.f32 %v1636_v56, %v421_v62 }
 0x5ed   :  { %425 = vrot.lane.b32.xlu0 %v423_v63, %s1688_s2 }
 0x65f   :  { %v426_v6 = vpop.permute.xlu0 %425 }
 0x660   :  { %1329 = vst.msk [vmem:[%s1995_s5 + $0x8] sm:$0xff] %vm41_vm1, %v426_v6  ;;  %1472 = vmatmul.mubr.msk.f32.vlgmr.msra.gmra.mrb[4].mxu1 %vm41_vm1, %v426_v6 }
 0x661   :  { %1585 = vmatpush3.bf16.msra.mxu1 %v1742_v9  ;;  %1493 = vmatprep.mubr.msk.f32.mxu1 %vm1686_vm0, %v1687_v4 }
 0x662   :  { %1586 = vmatprep.subr.bf16.mxu1 %v1685_v0 }
 0x665   :  { %1588 = vmatpush3.bf16.msra.mxu1 %v1758_v15 }
 0x666   :  { %1595 = vmatprep.subr.bf16.mxu1 %v1685_v0 }
 0x733   :  { %v500_v7 = vpop.f32.mrb[4].mxu1 }
 0x734   :  { %v511_v8 = vadd.f32 %v500_v7, %v1780_v17  ;;  %v1473_v10 = vpop.f32.mrb[5].mxu1  ;;  %v504_v12 = vadd.f32 %v500_v7, %v431_v11 }
 0x735   :  { %v651_v10 = vld [vmem:[#allocation2 + $0x20] sm:$0xff] }
 0x736   :  { %513 = vrot.lane.b32.xlu1 %v511_v8, %s1688_s2  ;;  %v1331_v13 = vmul.f32 -1.442695, %v504_v12 }
 0x738   :  { %1637 = vpow2.f32 %v1331_v13 }
 0x742   :  { %v1638_v14 = vpop.eup %1637 }
 0x743   :  { %v508_v16 = vadd.f32 1.0, %v1638_v14 }
 0x745   :  { %1639 = vrcp.f32 %v508_v16 }
 0x74f   :  { %v1640_v19 = vpop.eup %1639 }
 0x7a8   :  { %v514_v20 = vpop.permute.xlu1 %513 }
 0x7a9   :  { %v516_v21 = vmul.f32 %v1640_v19, %v514_v20 }
 0x7ab   :  { %518 = vrot.lane.b32.xlu0 %v516_v21, %s1688_s2 }
 0x81d   :  { %v519_v22 = vpop.permute.xlu0 %518 }
 0x81e   :  { %v521_v23 = vadd.f32 %v519_v22, %v431_v11 }
 0x820   :  { %1641 = vtanh.f32 %v521_v23 }
 0x82a   :  { %v1642_v24 = vpop.eup %1641 }
 0x82b   :  { %v523_v25 = vsub.f32 %v423_v63, %v1642_v24 }
 0x82d   :  { %525 = vrot.lane.b32.xlu1 %v523_v25, %s1689_s3 }
 0x89f   :  { %v526_v32 = vpop.permute.xlu1 %525 }
 0x8a0   :  { %v528_v33 = vmul.f32 %v1640_v19, %v526_v32 }
 0x8a2   :  { %530 = vrot.lane.b32.xlu0 %v528_v33, %s1690_s15  ;;  %v761_v33 = vld [vmem:[#allocation2 + $0x28] sm:$0xff] }
 0x914   :  { %v531_v34 = vpop.permute.xlu0 %530 }
 0x915   :  { %v533_v35 = vadd.f32 %v1642_v24, %v531_v34 }
 0x917   :  { %535 = vrot.lane.b32.xlu1 %v533_v35, %s1688_s2 }
 0x989   :  { %v536_v48 = vpop.permute.xlu1 %535 }
 0x98a   :  { %1332 = vst.msk [vmem:[%s1995_s5 + $0x10] sm:$0xff] %vm41_vm1, %v536_v48  ;;  %1483 = vmatmul.mubr.msk.f32.vlgmr.msra.gmra.mrb[10].mxu0 %vm41_vm1, %v536_v48 }
 0x98b   :  { %1591 = vmatpush3.bf16.msra.mxu0 %v1742_v9  ;;  %1504 = vmatprep.mubr.msk.f32.mxu0 %vm1686_vm0, %v1687_v4 }
 0x98c   :  { %1592 = vmatprep.subr.bf16.mxu0 %v1685_v0 }
 0x98f   :  { %1594 = vmatpush3.bf16.msra.mxu0 %v1758_v15 }
 0x990   :  { %1601 = vmatprep.subr.bf16.mxu0 %v1685_v0 }
 0xa5d   :  { %v610_v18 = vpop.f32.mrb[10].mxu0 }
 0xa5e   :  { %v621_v49 = vadd.f32 %v610_v18, %v1780_v17  ;;  %v1484_v50 = vpop.f32.mrb[11].mxu0  ;;  %v614_v52 = vadd.f32 %v610_v18, %v541_v51 }
 0xa60   :  { %623 = vrot.lane.b32.xlu0 %v621_v49, %s1688_s2  ;;  %v1334_v53 = vmul.f32 -1.442695, %v614_v52  ;;  %v871_v52 = vld [vmem:[#allocation2 + $0x30] sm:$0xff] }
 0xa62   :  { %1643 = vpow2.f32 %v1334_v53 }
 0xa6c   :  { %v1644_v54 = vpop.eup %1643 }
 0xa6d   :  { %v618_v55 = vadd.f32 1.0, %v1644_v54 }
 0xa6f   :  { %1645 = vrcp.f32 %v618_v55 }
 0xa79   :  { %v1646_v56 = vpop.eup %1645 }
 0xad2   :  { %v624_v57 = vpop.permute.xlu0 %623 }
 0xad3   :  { %v626_v58 = vmul.f32 %v1646_v56, %v624_v57 }
 0xad5   :  { %628 = vrot.lane.b32.xlu1 %v626_v58, %s1688_s2 }
 0xb47   :  { %v629_v59 = vpop.permute.xlu1 %628 }
 0xb48   :  { %v631_v60 = vadd.f32 %v629_v59, %v541_v51 }
 0xb4a   :  { %1647 = vtanh.f32 %v631_v60 }
 0xb54   :  { %v1648_v61 = vpop.eup %1647 }
 0xb55   :  { %v633_v62 = vsub.f32 %v533_v35, %v1648_v61 }
 0xb57   :  { %635 = vrot.lane.b32.xlu0 %v633_v62, %s1689_s3 }
 0xbc9   :  { %v636_v63 = vpop.permute.xlu0 %635 }
 0xbca   :  { %v638_v1 = vmul.f32 %v1646_v56, %v636_v63 }
 0xbcc   :  { %640 = vrot.lane.b32.xlu1 %v638_v1, %s1690_s15 }
 0xc3e   :  { %v641_v2 = vpop.permute.xlu1 %640 }
 0xc3f   :  { %v643_v3 = vadd.f32 %v1648_v61, %v641_v2 }
 0xc41   :  { %645 = vrot.lane.b32.xlu0 %v643_v3, %s1688_s2 }
 0xcb3   :  { %v646_v5 = vpop.permute.xlu0 %645 }
 0xcb4   :  { %1335 = vst.msk [vmem:[%s1995_s5 + $0x18] sm:$0xff] %vm41_vm1, %v646_v5  ;;  %1494 = vmatmul.mubr.msk.f32.vlgmr.msra.gmra.mrb[6].mxu1 %vm41_vm1, %v646_v5 }
 0xcb5   :  { %1597 = vmatpush3.bf16.msra.mxu1 %v1742_v9  ;;  %1515 = vmatprep.mubr.msk.f32.mxu1 %vm1686_vm0, %v1687_v4 }
 0xcb6   :  { %1598 = vmatprep.subr.bf16.mxu1 %v1685_v0 }
 0xcb9   :  { %1600 = vmatpush3.bf16.msra.mxu1 %v1758_v15 }
 0xcba   :  { %1607 = vmatprep.subr.bf16.mxu1 %v1685_v0 }
 0xd87   :  { %v720_v6 = vpop.f32.mrb[6].mxu1 }
 0xd88   :  { %v731_v7 = vadd.f32 %v720_v6, %v1780_v17  ;;  %v1495_v8 = vpop.f32.mrb[7].mxu1  ;;  %v724_v11 = vadd.f32 %v720_v6, %v651_v10 }
 0xd8a   :  { %733 = vrot.lane.b32.xlu1 %v731_v7, %s1688_s2  ;;  %v1337_v12 = vmul.f32 -1.442695, %v724_v11  ;;  %v981_v11 = vld [vmem:[#allocation2 + $0x38] sm:$0xff] }
 0xd8c   :  { %1649 = vpow2.f32 %v1337_v12 }
 0xd96   :  { %v1650_v13 = vpop.eup %1649 }
 0xd97   :  { %v728_v14 = vadd.f32 1.0, %v1650_v13 }
 0xd99   :  { %1651 = vrcp.f32 %v728_v14 }
 0xda3   :  { %v1652_v16 = vpop.eup %1651 }
 0xdfc   :  { %v734_v19 = vpop.permute.xlu1 %733 }
 0xdfd   :  { %v736_v20 = vmul.f32 %v1652_v16, %v734_v19 }
 0xdff   :  { %738 = vrot.lane.b32.xlu0 %v736_v20, %s1688_s2 }
 0xe71   :  { %v739_v21 = vpop.permute.xlu0 %738 }
 0xe72   :  { %v741_v22 = vadd.f32 %v739_v21, %v651_v10 }
 0xe74   :  { %1653 = vtanh.f32 %v741_v22 }
 0xe7e   :  { %v1654_v23 = vpop.eup %1653 }
 0xe7f   :  { %v743_v24 = vsub.f32 %v643_v3, %v1654_v23 }
 0xe81   :  { %745 = vrot.lane.b32.xlu1 %v743_v24, %s1689_s3 }
 0xef3   :  { %v746_v25 = vpop.permute.xlu1 %745 }
 0xef4   :  { %v748_v26 = vmul.f32 %v1652_v16, %v746_v25 }
 0xef6   :  { %750 = vrot.lane.b32.xlu0 %v748_v26, %s1690_s15 }
 0xf68   :  { %v751_v27 = vpop.permute.xlu0 %750 }
 0xf69   :  { %v753_v28 = vadd.f32 %v1654_v23, %v751_v27 }
 0xf6b   :  { %755 = vrot.lane.b32.xlu1 %v753_v28, %s1688_s2 }
 0xfdd   :  { %v756_v29 = vpop.permute.xlu1 %755 }
 0xfde   :  { %1338 = vst.msk [vmem:[%s1995_s5 + $0x20] sm:$0xff] %vm41_vm1, %v756_v29  ;;  %1505 = vmatmul.mubr.msk.f32.vlgmr.msra.gmra.mrb[12].mxu0 %vm41_vm1, %v756_v29 }
 0xfdf   :  { %1603 = vmatpush3.bf16.msra.mxu0 %v1742_v9  ;;  %1526 = vmatprep.mubr.msk.f32.mxu0 %vm1686_vm0, %v1687_v4 }
 0xfe0   :  { %1604 = vmatprep.subr.bf16.mxu0 %v1685_v0 }
 0xfe3   :  { %1606 = vmatpush3.bf16.msra.mxu0 %v1758_v15 }
 0xfe4   :  { %1613 = vmatprep.subr.bf16.mxu0 %v1685_v0 }
0x10b1   :  { %v830_v30 = vpop.f32.mrb[12].mxu0 }
0x10b2   :  { %v841_v31 = vadd.f32 %v830_v30, %v1780_v17  ;;  %v1506_v32 = vpop.f32.mrb[13].mxu0  ;;  %v834_v34 = vadd.f32 %v830_v30, %v761_v33  ;;  %v1091_v30 = vld [vmem:[#allocation2 + $0x40] sm:$0xff] }
0x10b4   :  { %843 = vrot.lane.b32.xlu0 %v841_v31, %s1688_s2  ;;  %v1340_v35 = vmul.f32 -1.442695, %v834_v34 }
0x10b6   :  { %1655 = vpow2.f32 %v1340_v35 }
0x10c0   :  { %v1656_v36 = vpop.eup %1655 }
0x10c1   :  { %v838_v37 = vadd.f32 1.0, %v1656_v36 }
0x10c3   :  { %1657 = vrcp.f32 %v838_v37 }
0x10cd   :  { %v1658_v38 = vpop.eup %1657 }
0x1126   :  { %v844_v39 = vpop.permute.xlu0 %843 }
0x1127   :  { %v846_v40 = vmul.f32 %v1658_v38, %v844_v39 }
0x1129   :  { %848 = vrot.lane.b32.xlu1 %v846_v40, %s1688_s2 }
0x119b   :  { %v849_v41 = vpop.permute.xlu1 %848 }
0x119c   :  { %v851_v42 = vadd.f32 %v849_v41, %v761_v33 }
0x119e   :  { %1659 = vtanh.f32 %v851_v42 }
0x11a8   :  { %v1660_v43 = vpop.eup %1659 }
0x11a9   :  { %v853_v44 = vsub.f32 %v753_v28, %v1660_v43 }
0x11ab   :  { %855 = vrot.lane.b32.xlu0 %v853_v44, %s1689_s3 }
0x121d   :  { %v856_v45 = vpop.permute.xlu0 %855 }
0x121e   :  { %v858_v46 = vmul.f32 %v1658_v38, %v856_v45 }
0x1220   :  { %860 = vrot.lane.b32.xlu1 %v858_v46, %s1690_s15 }
0x1292   :  { %v861_v47 = vpop.permute.xlu1 %860 }
0x1293   :  { %v863_v48 = vadd.f32 %v1660_v43, %v861_v47 }
0x1295   :  { %865 = vrot.lane.b32.xlu0 %v863_v48, %s1688_s2 }
0x1307   :  { %v866_v18 = vpop.permute.xlu0 %865 }
0x1308   :  { %1341 = vst.msk [vmem:[%s1995_s5 + $0x28] sm:$0xff] %vm41_vm1, %v866_v18  ;;  %1516 = vmatmul.mubr.msk.f32.vlgmr.msra.gmra.mrb[8].mxu1 %vm41_vm1, %v866_v18 }
0x1309   :  { %1609 = vmatpush3.bf16.msra.mxu1 %v1742_v9  ;;  %1537 = vmatprep.mubr.msk.f32.mxu1 %vm1686_vm0, %v1687_v4 }
0x130a   :  { %1610 = vmatprep.subr.bf16.mxu1 %v1685_v0 }
0x130d   :  { %1612 = vmatpush3.bf16.msra.mxu1 %v1758_v15 }
0x13db   :  { %v940_v49 = vpop.f32.mrb[8].mxu1 }
0x13dc   :  { %v951_v50 = vadd.f32 %v940_v49, %v1780_v17  ;;  %v1517_v51 = vpop.f32.mrb[9].mxu1  ;;  %v944_v53 = vadd.f32 %v940_v49, %v871_v52  ;;  %v1201_v49 = vld [vmem:[#allocation2 + $0x48] sm:$0xff] }
0x13de   :  { %953 = vrot.lane.b32.xlu1 %v951_v50, %s1688_s2  ;;  %v1343_v54 = vmul.f32 -1.442695, %v944_v53 }
0x13e0   :  { %1661 = vpow2.f32 %v1343_v54 }
0x13ea   :  { %v1662_v55 = vpop.eup %1661 }
0x13eb   :  { %v948_v56 = vadd.f32 1.0, %v1662_v55 }
0x13ed   :  { %1663 = vrcp.f32 %v948_v56 }
0x13f7   :  { %v1664_v57 = vpop.eup %1663 }
0x1450   :  { %v954_v58 = vpop.permute.xlu1 %953 }
0x1451   :  { %v956_v59 = vmul.f32 %v1664_v57, %v954_v58 }
0x1453   :  { %958 = vrot.lane.b32.xlu0 %v956_v59, %s1688_s2 }
0x14c5   :  { %v959_v60 = vpop.permute.xlu0 %958 }
0x14c6   :  { %v961_v61 = vadd.f32 %v959_v60, %v871_v52 }
0x14c8   :  { %1665 = vtanh.f32 %v961_v61 }
0x14d2   :  { %v1666_v62 = vpop.eup %1665 }
0x14d3   :  { %v963_v63 = vsub.f32 %v863_v48, %v1666_v62 }
0x14d5   :  { %965 = vrot.lane.b32.xlu1 %v963_v63, %s1689_s3 }
0x1547   :  { %v966_v1 = vpop.permute.xlu1 %965 }
0x1548   :  { %v968_v2 = vmul.f32 %v1664_v57, %v966_v1 }
0x154a   :  { %970 = vrot.lane.b32.xlu0 %v968_v2, %s1690_s15 }
0x15bc   :  { %v971_v3 = vpop.permute.xlu0 %970 }
0x15bd   :  { %v973_v5 = vadd.f32 %v1666_v62, %v971_v3 }
0x15bf   :  { %975 = vrot.lane.b32.xlu1 %v973_v5, %s1688_s2 }
0x1631   :  { %v976_v6 = vpop.permute.xlu1 %975 }
0x1632   :  { %1344 = vst.msk [vmem:[%s1995_s5 + $0x30] sm:$0xff] %vm41_vm1, %v976_v6  ;;  %1527 = vmatmul.mubr.msk.f32.vlgmr.msra.gmra.mrb[14].mxu0 %vm41_vm1, %v976_v6 }
0x1633   :  { %1615 = vmatpush3.bf16.msra.mxu0 %v1742_v9  ;;  %1548 = vmatprep.mubr.msk.f32.mxu0 %vm1686_vm0, %v1687_v4 }
0x1634   :  { %1616 = vmatprep.subr.bf16.mxu0 %v1685_v0 }
0x1637   :  { %1618 = vmatpush3.bf16.msra.mxu0 %v1758_v15 }
0x1705   :  { %v1050_v7 = vpop.f32.mrb[14].mxu0 }
0x1706   :  { %v1061_v8 = vadd.f32 %v1050_v7, %v1780_v17  ;;  %v1528_v10 = vpop.f32.mrb[15].mxu0  ;;  %v1054_v12 = vadd.f32 %v1050_v7, %v981_v11 }
0x1708   :  { %1063 = vrot.lane.b32.xlu0 %v1061_v8, %s1688_s2  ;;  %v1346_v13 = vmul.f32 -1.442695, %v1054_v12 }
0x170a   :  { %1667 = vpow2.f32 %v1346_v13 }
0x1714   :  { %v1668_v14 = vpop.eup %1667 }
0x1715   :  { %v1058_v16 = vadd.f32 1.0, %v1668_v14 }
0x1717   :  { %1669 = vrcp.f32 %v1058_v16 }
0x1721   :  { %v1670_v9 = vpop.eup %1669 }
0x177a   :  { %v1064_v19 = vpop.permute.xlu0 %1063 }
0x177b   :  { %v1066_v4 = vmul.f32 %v1670_v9, %v1064_v19 }
0x177d   :  { %1068 = vrot.lane.b32.xlu1 %v1066_v4, %s1688_s2 }
0x17ef   :  { %v1069_v0 = vpop.permute.xlu1 %1068 }
0x17f0   :  { %v1071_v15 = vadd.f32 %v1069_v0, %v981_v11 }
0x17f2   :  { %1671 = vtanh.f32 %v1071_v15 }
0x17fc   :  { %v1672_v20 = vpop.eup %1671 }
0x17fd   :  { %v1073_v21 = vsub.f32 %v973_v5, %v1672_v20 }
0x17ff   :  { %1075 = vrot.lane.b32.xlu0 %v1073_v21, %s1689_s3 }
0x1871   :  { %v1076_v22 = vpop.permute.xlu0 %1075 }
0x1872   :  { %v1078_v23 = vmul.f32 %v1670_v9, %v1076_v22 }
0x1874   :  { %1080 = vrot.lane.b32.xlu1 %v1078_v23, %s1690_s15 }
0x18e6   :  { %v1081_v24 = vpop.permute.xlu1 %1080 }
0x18e7   :  { %v1083_v25 = vadd.f32 %v1672_v20, %v1081_v24 }
0x18e9   :  { %1085 = vrot.lane.b32.xlu0 %v1083_v25, %s1688_s2 }
0x195b   :  { %v1086_v26 = vpop.permute.xlu0 %1085 }
0x195c   :  { %1347 = vst.msk [vmem:[%s1995_s5 + $0x38] sm:$0xff] %vm41_vm1, %v1086_v26  ;;  %1538 = vmatmul.mubr.msk.f32.vlgmr.msra.gmra.mrb[10].mxu1 %vm41_vm1, %v1086_v26 }
0x1a2f   :  { %v1160_v27 = vpop.f32.mrb[10].mxu1 }
0x1a30   :  { %v1171_v28 = vadd.f32 %v1160_v27, %v1780_v17  ;;  %v1539_v29 = vpop.f32.mrb[11].mxu1  ;;  %v1164_v31 = vadd.f32 %v1160_v27, %v1091_v30 }
0x1a32   :  { %1173 = vrot.lane.b32.xlu1 %v1171_v28, %s1688_s2  ;;  %v1349_v32 = vmul.f32 -1.442695, %v1164_v31 }
0x1a34   :  { %1673 = vpow2.f32 %v1349_v32 }
0x1a3e   :  { %v1674_v33 = vpop.eup %1673 }
0x1a3f   :  { %v1168_v34 = vadd.f32 1.0, %v1674_v33 }
0x1a41   :  { %1675 = vrcp.f32 %v1168_v34 }
0x1a4b   :  { %v1676_v35 = vpop.eup %1675 }
0x1aa4   :  { %v1174_v36 = vpop.permute.xlu1 %1173 }
0x1aa5   :  { %v1176_v37 = vmul.f32 %v1676_v35, %v1174_v36 }
0x1aa7   :  { %1178 = vrot.lane.b32.xlu0 %v1176_v37, %s1688_s2 }
0x1b19   :  { %v1179_v38 = vpop.permute.xlu0 %1178 }
0x1b1a   :  { %v1181_v39 = vadd.f32 %v1179_v38, %v1091_v30 }
0x1b1c   :  { %1677 = vtanh.f32 %v1181_v39 }
0x1b26   :  { %v1678_v40 = vpop.eup %1677 }
0x1b27   :  { %v1183_v41 = vsub.f32 %v1083_v25, %v1678_v40 }
0x1b29   :  { %1185 = vrot.lane.b32.xlu1 %v1183_v41, %s1689_s3 }
0x1b9b   :  { %v1186_v42 = vpop.permute.xlu1 %1185 }
0x1b9c   :  { %v1188_v43 = vmul.f32 %v1676_v35, %v1186_v42 }
0x1b9e   :  { %1190 = vrot.lane.b32.xlu0 %v1188_v43, %s1690_s15 }
0x1c10   :  { %v1191_v44 = vpop.permute.xlu0 %1190 }
0x1c11   :  { %v1193_v45 = vadd.f32 %v1678_v40, %v1191_v44 }
0x1c13   :  { %1195 = vrot.lane.b32.xlu1 %v1193_v45, %s1688_s2 }
0x1c85   :  { %v1196_v46 = vpop.permute.xlu1 %1195 }
0x1c86   :  { %1350 = vst.msk [vmem:[%s1995_s5 + $0x40] sm:$0xff] %vm41_vm1, %v1196_v46  ;;  %1549 = vmatmul.mubr.msk.f32.vlgmr.msra.gmra.mrb[16].mxu0 %vm41_vm1, %v1196_v46 }
0x1d59   :  { %v1270_v47 = vpop.f32.mrb[16].mxu0 }
0x1d5a   :  { %v1281_v48 = vadd.f32 %v1270_v47, %v1780_v17  ;;  %v1550_v18 = vpop.f32.mrb[17].mxu0  ;;  %v1274_v50 = vadd.f32 %v1270_v47, %v1201_v49 }
0x1d5c   :  { %1283 = vrot.lane.b32.xlu0 %v1281_v48, %s1688_s2  ;;  %v1352_v51 = vmul.f32 -1.442695, %v1274_v50 }
0x1d5e   :  { %1679 = vpow2.f32 %v1352_v51 }
0x1d68   :  { %v1680_v52 = vpop.eup %1679 }
0x1d69   :  { %v1278_v53 = vadd.f32 1.0, %v1680_v52 }
0x1d6b   :  { %1681 = vrcp.f32 %v1278_v53 }
0x1d75   :  { %v1682_v54 = vpop.eup %1681 }
0x1dce   :  { %v1284_v55 = vpop.permute.xlu0 %1283 }
0x1dcf   :  { %v1286_v56 = vmul.f32 %v1682_v54, %v1284_v55 }
0x1dd1   :  { %1288 = vrot.lane.b32.xlu1 %v1286_v56, %s1688_s2 }
0x1e43   :  { %v1289_v57 = vpop.permute.xlu1 %1288 }
0x1e44   :  { %v1291_v58 = vadd.f32 %v1289_v57, %v1201_v49 }
0x1e46   :  { %1683 = vtanh.f32 %v1291_v58 }
0x1e50   :  { %v1684_v59 = vpop.eup %1683 }
0x1e51   :  { %v1293_v17 = vsub.f32 %v1193_v45, %v1684_v59 }
0x1e53   :  { %1295 = vrot.lane.b32.xlu0 %v1293_v17, %s1689_s3 }
0x1ec5   :  { %v1296_v60 = vpop.permute.xlu0 %1295 }
0x1ec6   :  { %v1298_v61 = vmul.f32 %v1682_v54, %v1296_v60 }
0x1ec8   :  { %1300 = vrot.lane.b32.xlu1 %v1298_v61, %s1690_s15 }
0x1f3a   :  { %v1301_v62 = vpop.permute.xlu1 %1300 }
0x1f3b   :  { %v1303_v63 = vadd.f32 %v1684_v59, %v1301_v62 }
0x1f3d   :  { %1305 = vrot.lane.b32.xlu0 %v1303_v63, %s1688_s2 }
0x1faf   :  { %v1306_v1 = vpop.permute.xlu0 %1305 }
0x1fb0   :  { %1353 = vst.msk [vmem:[%s1995_s5 + $0x48] sm:$0xff] %vm41_vm1, %v1306_v1 }

</bundles_post_ra>
